<compile_context>
chip_gen: v5e
topology: v5e:2x2
jax: 0.10.0
libtpu: 0.0.40
codegen_flags: <defaults>
</compile_context>

<pallas_src>
import jax
import jax.numpy as jnp
from jax.experimental import pallas as pl
from jax.experimental.pallas import tpu as pltpu


def _conv1x1_kernel(w_ref, b_ref, x_ref, o_ref):
    # w_ref: SMEM (C_out*C_in,) f32 weights (flattened, row-major [c_out, c_in])
    # b_ref: SMEM (C_out,)      f32 bias
    # x_ref: VMEM (1, C_in, R, 128)  dense activation tile
    # o_ref: VMEM (1, C_out, R, 128) dense output tile
    c_in = x_ref.shape[1]
    c_out = o_ref.shape[1]
    r, lanes = x_ref.shape[2], x_ref.shape[3]

    # Init accumulators with bias (scalar broadcast from SMEM).
    accs = [jnp.full((r, lanes), b_ref[c], dtype=jnp.float32) for c in range(c_out)]

    # k-outer streaming: one dense (R, 128) input slab per input channel,
    # FMA'd into every output-channel accumulator (all loops unrolled; C_in/C_out tiny).
    for k in range(c_in):
        xk = x_ref[0, k].astype(jnp.float32)            # (R, 128) dense slab
        for c in range(c_out):
            accs[c] = accs[c] + xk * w_ref[c * c_in + k]

    # Direct per-row stores (no concatenate / sublane relayout).
    for c in range(c_out):
        o_ref[0, c] = accs[c].astype(o_ref.dtype)


def _choose_row_tile(rows, n_batch, max_rows=512):
    """Pick a row tile (multiple of 8, or the full extent if rows <= 8)."""
    if rows <= 8:
        return rows                       # block == full dim: always legal
    r = min(rows, max_rows)
    r = max((r // 8) * 8, 8)
    if n_batch == 1:
        # Force >=2 spatial grid steps so both v7x TensorCores get work.
        while rows <= r and r > 8:
            r = max(((r // 2) // 8) * 8, 8)
    return r


def skip_connection_filter(x_nchw, weight, bias):
    """1x1 conv (stride 1, bias): out[n,o,p] = sum_c w[o,c] * x[n,c,p] + b[o].

    x_nchw : (N, C_in, H, W)
    weight : (C_out, C_in)   (PyTorch conv weight squeezed over the 1x1 dims)
    bias   : (C_out,)
    returns: (N, C_out, H, W)
    """
    N, C_in, H, W = x_nchw.shape
    C_out = weight.shape[0]
    HW = H * W

    # Lane-dense layout: pad spatial to a multiple of 128, then to a multiple
    # of the row tile, and reshape to (N, C_in, rows, 128).
    rows = pl.cdiv(HW, 128)
    r_tile = _choose_row_tile(rows, N)
    rows_padded = pl.cdiv(rows, r_tile) * r_tile
    hw_padded = rows_padded * 128

    x3d = x_nchw.reshape(N, C_in, HW)
    if hw_padded != HW:
        x3d = jnp.pad(x3d, ((0, 0), (0, 0), (0, hw_padded - HW)))
    x4d = x3d.reshape(N, C_in, rows_padded, 128)

    # Parameters as 32-bit scalars for SMEM (flatten weight to 1-D to avoid
    # the 2-D SMEM padding slab).
    w_flat = weight.astype(jnp.float32).reshape(-1)     # (C_out*C_in,)
    b_flat = bias.astype(jnp.float32)                   # (C_out,)

    grid = (N, rows_padded // r_tile)
    dtype_bytes = jnp.dtype(x_nchw.dtype).itemsize

    out4d = pl.pallas_call(
        _conv1x1_kernel,
        out_shape=jax.ShapeDtypeStruct((N, C_out, rows_padded, 128), x_nchw.dtype),
        grid_spec=pltpu.PrefetchScalarGridSpec(
            num_scalar_prefetch=0,
            grid=grid,
            in_specs=[
                pl.BlockSpec(memory_space=pltpu.MemorySpace.SMEM),   # weights
                pl.BlockSpec(memory_space=pltpu.MemorySpace.SMEM),   # bias
                pl.BlockSpec((1, C_in, r_tile, 128), lambda n, s: (n, 0, s, 0)),
            ],
            out_specs=pl.BlockSpec((1, C_out, r_tile, 128), lambda n, s: (n, 0, s, 0)),
        ),
        compiler_params=pltpu.CompilerParams(
            dimension_semantics=("parallel", "parallel")),
        cost_estimate=pl.CostEstimate(
            flops=2 * N * C_out * C_in * hw_padded,
            transcendentals=0,
            bytes_accessed=(C_in + C_out) * N * hw_padded * dtype_bytes),
    )(w_flat, b_flat, x4d)

    out3d = out4d.reshape(N, C_out, hw_padded)
    if hw_padded != HW:
        out3d = out3d[:, :, :HW]
    return out3d.reshape(N, C_out, H, W)


if __name__ == "__main__":
    # Module config: input_feature=4, compression_ratio=0.5 -> output_feature=2
    input_feature = 4
    compression_ratio = 0.5
    output_feature = int(input_feature * compression_ratio)

    key = jax.random.PRNGKey(0)
    kx, kw, kb = jax.random.split(key, 3)

    N, H, W = 2, 16, 16
    x = jax.random.normal(kx, (N, input_feature, H, W), dtype=jnp.float32)
    weight = jax.random.normal(kw, (output_feature, input_feature), dtype=jnp.float32) * 0.1
    bias = jax.random.normal(kb, (output_feature,), dtype=jnp.float32) * 0.1

    out = jax.block_until_ready(skip_connection_filter(x, weight, bias))

    # Pure-JAX reference: 1x1 conv == einsum over channel axis + bias.
    ref = jnp.einsum("nchw,oc->nohw", x, weight) + bias[None, :, None, None]
    assert out.shape == (N, output_feature, H, W)
    assert jnp.allclose(out, ref, atol=1e-5, rtol=1e-5)

    print("KERNEL_OK")
</pallas_src>

<mosaic_0001>
module attributes {stable_mosaic.version = 11 : i64} {
  func.func @_conv1x1_kernel(%arg0: i32, %arg1: i32, %arg2: memref<8xf32, #tpu.memory_space<smem>>, %arg3: memref<2xf32, #tpu.memory_space<smem>>, %arg4: memref<1x4x2x128xf32, #tpu.memory_space<vmem>>, %arg5: memref<1x2x2x128xf32, #tpu.memory_space<vmem>>) attributes {dimension_semantics = [#tpu.dimension_semantics<parallel>, #tpu.dimension_semantics<parallel>], iteration_bounds = array<i64: 2, 1>, scalar_prefetch = 0 : i64, scratch_operands = 0 : i64, tpu.core_type = #tpu.core_type<tc>, window_params = [{transform_indices = @transform_0, window_bounds = array<i64: 8>}, {transform_indices = @transform_1, window_bounds = array<i64: 2>}, {transform_indices = @transform_2, window_bounds = array<i64: 1, 4, 2, 128>}, {transform_indices = @transform_3, window_bounds = array<i64: 1, 2, 2, 128>}]} {
    %c0 = arith.constant 0 : index
    %0 = memref.load %arg3[%c0] : memref<2xf32, #tpu.memory_space<smem>>
    %1 = vector.broadcast %0 : f32 to vector<2x128xf32>
    %c1 = arith.constant 1 : index
    %2 = memref.load %arg3[%c1] : memref<2xf32, #tpu.memory_space<smem>>
    %3 = vector.broadcast %2 : f32 to vector<2x128xf32>
    %c0_0 = arith.constant 0 : index
    %c0_1 = arith.constant 0 : index
    %c0_2 = arith.constant 0 : index
    %c0_3 = arith.constant 0 : index
    %4 = vector.load %arg4[%c0_0, %c0_1, %c0_2, %c0_3] : memref<1x4x2x128xf32, #tpu.memory_space<vmem>>, vector<1x1x2x128xf32>
    %5 = vector.shape_cast %4 : vector<1x1x2x128xf32> to vector<2x128xf32>
    %c0_4 = arith.constant 0 : index
    %6 = memref.load %arg2[%c0_4] : memref<8xf32, #tpu.memory_space<smem>>
    %7 = vector.broadcast %6 : f32 to vector<2x128xf32>
    %8 = arith.mulf %5, %7 : vector<2x128xf32>
    %9 = arith.addf %1, %8 : vector<2x128xf32>
    %c4 = arith.constant 4 : index
    %10 = memref.load %arg2[%c4] : memref<8xf32, #tpu.memory_space<smem>>
    %11 = vector.broadcast %10 : f32 to vector<2x128xf32>
    %12 = arith.mulf %5, %11 : vector<2x128xf32>
    %13 = arith.addf %3, %12 : vector<2x128xf32>
    %c0_5 = arith.constant 0 : index
    %c1_6 = arith.constant 1 : index
    %c0_7 = arith.constant 0 : index
    %c0_8 = arith.constant 0 : index
    %14 = vector.load %arg4[%c0_5, %c1_6, %c0_7, %c0_8] : memref<1x4x2x128xf32, #tpu.memory_space<vmem>>, vector<1x1x2x128xf32>
    %15 = vector.shape_cast %14 : vector<1x1x2x128xf32> to vector<2x128xf32>
    %c1_9 = arith.constant 1 : index
    %16 = memref.load %arg2[%c1_9] : memref<8xf32, #tpu.memory_space<smem>>
    %17 = vector.broadcast %16 : f32 to vector<2x128xf32>
    %18 = arith.mulf %15, %17 : vector<2x128xf32>
    %19 = arith.addf %9, %18 : vector<2x128xf32>
    %c5 = arith.constant 5 : index
    %20 = memref.load %arg2[%c5] : memref<8xf32, #tpu.memory_space<smem>>
    %21 = vector.broadcast %20 : f32 to vector<2x128xf32>
    %22 = arith.mulf %15, %21 : vector<2x128xf32>
    %23 = arith.addf %13, %22 : vector<2x128xf32>
    %c0_10 = arith.constant 0 : index
    %c2 = arith.constant 2 : index
    %c0_11 = arith.constant 0 : index
    %c0_12 = arith.constant 0 : index
    %24 = vector.load %arg4[%c0_10, %c2, %c0_11, %c0_12] : memref<1x4x2x128xf32, #tpu.memory_space<vmem>>, vector<1x1x2x128xf32>
    %25 = vector.shape_cast %24 : vector<1x1x2x128xf32> to vector<2x128xf32>
    %c2_13 = arith.constant 2 : index
    %26 = memref.load %arg2[%c2_13] : memref<8xf32, #tpu.memory_space<smem>>
    %27 = vector.broadcast %26 : f32 to vector<2x128xf32>
    %28 = arith.mulf %25, %27 : vector<2x128xf32>
    %29 = arith.addf %19, %28 : vector<2x128xf32>
    %c6 = arith.constant 6 : index
    %30 = memref.load %arg2[%c6] : memref<8xf32, #tpu.memory_space<smem>>
    %31 = vector.broadcast %30 : f32 to vector<2x128xf32>
    %32 = arith.mulf %25, %31 : vector<2x128xf32>
    %33 = arith.addf %23, %32 : vector<2x128xf32>
    %c0_14 = arith.constant 0 : index
    %c3 = arith.constant 3 : index
    %c0_15 = arith.constant 0 : index
    %c0_16 = arith.constant 0 : index
    %34 = vector.load %arg4[%c0_14, %c3, %c0_15, %c0_16] : memref<1x4x2x128xf32, #tpu.memory_space<vmem>>, vector<1x1x2x128xf32>
    %35 = vector.shape_cast %34 : vector<1x1x2x128xf32> to vector<2x128xf32>
    %c3_17 = arith.constant 3 : index
    %36 = memref.load %arg2[%c3_17] : memref<8xf32, #tpu.memory_space<smem>>
    %37 = vector.broadcast %36 : f32 to vector<2x128xf32>
    %38 = arith.mulf %35, %37 : vector<2x128xf32>
    %39 = arith.addf %29, %38 : vector<2x128xf32>
    %c7 = arith.constant 7 : index
    %40 = memref.load %arg2[%c7] : memref<8xf32, #tpu.memory_space<smem>>
    %41 = vector.broadcast %40 : f32 to vector<2x128xf32>
    %42 = arith.mulf %35, %41 : vector<2x128xf32>
    %43 = arith.addf %33, %42 : vector<2x128xf32>
    %c0_18 = arith.constant 0 : index
    %c0_19 = arith.constant 0 : index
    %c0_20 = arith.constant 0 : index
    %c0_21 = arith.constant 0 : index
    %44 = vector.load %arg5[%c0_18, %c0_19, %c0_20, %c0_21] : memref<1x2x2x128xf32, #tpu.memory_space<vmem>>, vector<1x1x2x128xf32>
    %45 = vector.shape_cast %44 : vector<1x1x2x128xf32> to vector<2x128xf32>
    %46 = vector.shape_cast %39 : vector<2x128xf32> to vector<1x1x2x128xf32>
    tpu.vector_store %arg5[%c0_18, %c0_19, %c0_20, %c0_21], %46 {strides = array<i32>} : memref<1x2x2x128xf32, #tpu.memory_space<vmem>>, vector<1x1x2x128xf32>,
    %c0_22 = arith.constant 0 : index
    %c1_23 = arith.constant 1 : index
    %c0_24 = arith.constant 0 : index
    %c0_25 = arith.constant 0 : index
    %47 = vector.load %arg5[%c0_22, %c1_23, %c0_24, %c0_25] : memref<1x2x2x128xf32, #tpu.memory_space<vmem>>, vector<1x1x2x128xf32>
    %48 = vector.shape_cast %47 : vector<1x1x2x128xf32> to vector<2x128xf32>
    %49 = vector.shape_cast %43 : vector<2x128xf32> to vector<1x1x2x128xf32>
    tpu.vector_store %arg5[%c0_22, %c1_23, %c0_24, %c0_25], %49 {strides = array<i32>} : memref<1x2x2x128xf32, #tpu.memory_space<vmem>>, vector<1x1x2x128xf32>,
    return
  }
  func.func @transform_0(%arg0: i32, %arg1: i32) -> i32 {
    %c0_i32 = arith.constant 0 : i32
    %c0_i32_0 = arith.constant 0 : i32
    return %c0_i32 : i32
  }
  func.func @transform_1(%arg0: i32, %arg1: i32) -> i32 {
    %c0_i32 = arith.constant 0 : i32
    %c0_i32_0 = arith.constant 0 : i32
    return %c0_i32 : i32
  }
  func.func @transform_2(%arg0: i32, %arg1: i32) -> (i32, i32, i32, i32) {
    %c0_i32 = arith.constant 0 : i32
    %c0_i32_0 = arith.constant 0 : i32
    %c0_i32_1 = arith.constant 0 : i32
    return %arg0, %c0_i32, %arg1, %c0_i32_0 : i32, i32, i32, i32
  }
  func.func @transform_3(%arg0: i32, %arg1: i32) -> (i32, i32, i32, i32) {
    %c0_i32 = arith.constant 0 : i32
    %c0_i32_0 = arith.constant 0 : i32
    %c0_i32_1 = arith.constant 0 : i32
    return %arg0, %c0_i32, %arg1, %c0_i32_0 : i32, i32, i32, i32
  }
}

</mosaic_0001>

<bundles_post_ra>
// kernel: tpu_custom_call.1
= control target key start
LH: loop header
LB: loop body
LE: loop exit
PB: predicated region body
PF: predicated region fallthrough
CT: control target
= control target key end

     0   :  { %s865_s0 = inlined_call_operand.hbm [shape: f32[8], index: 0, kind: input, shape index: {}]   ;;  %s866_s1 = inlined_call_operand.hbm [shape: f32[2], index: 1, kind: input, shape index: {}]   ;;  %s867_s2 = inlined_call_operand.hbm [shape: f32[2,4,2,128], index: 2, kind: input, shape index: {}]   ;;  %s868_s3 = inlined_call_operand.hbm [shape: f32[2,2,2,128], index: 3, kind: output, shape index: {}]  }
   0x1   :  { %869 = sst [smem:[#allocation14_spill]] %s865_s0 }
   0x2   :  { %8 = vsyncpa [#allocation5], 0 }
   0x3   :  { %9 = vsyncpa [#allocation7], 0 }
   0x4   :  { %10 = vsyncpa [#allocation3], 0 }
   0x5   :  { %12 = vsyncpa [#allocation3 + $0x1], 0 }
   0x6   :  { %13 = vsyncpa [#allocation4], 0 }
   0x7   :  { %15 = vsyncpa [#allocation4 + $0x1], 0  ;;  %s703_s12 = smov 0   ;;  %s705_s13 = smov 0  }
   0x8   :  { %s707_s14 = smov 0   ;;  %s709_s15 = smov 0  }
   0x9   :  { %s711_s16 = smov 0   ;;  %s713_s17 = smov 0  }
   0xa LB: > { %s405_s18 = sadd.s32 4294967295, %s675_s17   ;;  %s406_s19 = sadd.s32 4294967294, %s675_s17   ;;  %s675_s17 = sphi %s713_s17, %s21_s17   ;;  %s671_s16 = sphi %s711_s16, %s882_s16   ;;  %s667_s15 = sphi %s709_s15, %s881_s15   ;;  %s663_s14 = sphi %s707_s14, %s880_s14   ;;  %s659_s13 = sphi %s705_s13, %s879_s13   ;;  %s655_s12 = sphi %s703_s12, %s878_s12  }
   0xb   : > { %s84_s20 = sadd.s32 1, %s663_s14  ;;  %p91_p0 = scmp.ne.s32.totalorder %s663_s14, %s659_s13 }
   0xc   : > { %p92_p1 = scmp.eq.s32.totalorder %s675_s17, 0  ;;  %p97_p2 = scmp.ne.s32.totalorder %s659_s13, %s655_s12 }
   0xd   : > { %p741_p3 = scmp.eq.s32.totalorder %s405_s18, 0  ;;  %p123_p4 = scmp.eq.s32.totalorder %s405_s18, 1 }
   0xe   : > { %p745_p5 = por %p92_p1, %p91_p0  ;;  %p129_p6 = scmp.eq.s32.totalorder %s406_s19, 1 }
   0xf   : > { %p751_p7 = por %p741_p3, %p97_p2  ;;  %p755_p8 = por %p123_p4, %p91_p0 }
  0x10   : > { %p759_p9 = por %p129_p6, %p97_p2  ;;  %p407_p10 = scmp.ge.s32.totalorder %s675_s17, 1 }
  0x11   : > { %p136_p11 = scmp.lt.s32.totalorder %s675_s17, 3  ;;  %s875_s0 = sld [smem:[#allocation14_spill]] }
  0x12   : > { %p410_p13 = scmp.ge.s32.totalorder %s675_s17, 2  ;;  %p467_p0 = scmp.lt.s32.totalorder %s675_s17, 2 }
  0x13   : > { %p768_p12 = pnand %p407_p10, %p136_p11  ;;  %s158_s5 = sshll.u32 %s866_s1, 4  ;;  %s159_s5 = int_to_ptr.hbm [resolvable:$true] %s158_s5 }
  0x14   : > { %p781_p2 = pnand %p467_p0, %p745_p5  ;;  %s677_s7 = smov [#allocation2]  }
  0x15   : > { %p450_p1 = pneg %p768_p12  ;;  %s678_s8 = smov [#allocation6]  }
  0x16   : > { %s33_s9 = sadd.s32 1, %s671_s16  ;;  %s169_s10 = sand.u32 1, %s663_s14  }
  0x17   : > { %s148_s28 = sshll.u32 %s875_s0, 4  ;;  %p451_p4 = pnand %p450_p1, %p741_p3  ;;  %s149_s28 = int_to_ptr.hbm [resolvable:$true] %s148_s28 }
  0x18   : > { %p35_p6 = scmp.ge.s32.totalorder %s33_s9, 2  ;;  %s411_s11 = sshll.u32 %s169_s10, 3 }
  0x19   : > { %453 = dma.hbm_to_smem (!%p451_p4), %s149_s28, 16, %s677_s7, [#allocation5]  }
  0x1a   : > { %456 = dma.hbm_to_smem (!%p451_p4), %s159_s5, 16, %s678_s8, [#allocation7]  }
  0x1b   : > { %s436_s18 = sshll.u32 %s671_s16, 3  ;;  %s884_s9 = smov (%p35_p6, %s33_s9), 0 }
  0x1c   : > { %s179_s26 = scalar_lea.hbm %s867_s2, %s436_s18  ;;  %s79_s27 = ssub.s32 %s671_s16, %s884_s9 }
  0x1d   : > { %s180_s30 = sshll.u32 %s179_s26, 4  ;;  %p82_p5 = scmp.eq.s32.totalorder %s79_s27, 0  ;;  %s181_s30 = int_to_ptr.hbm [resolvable:$true] %s180_s30 }
  0x1e   : > { %s173_s28 = scalar_lea.vmem [#allocation8], %s411_s11  ;;  %s170_s7 = scalar_lea.sflag [#allocation3], %s169_s10 }
  0x1f   : > { %s182_s4 = sshll.u32 %s173_s28, 4  ;;  %s679_s8 = smov 32   ;;  %s183_s4 = int_to_ptr.vmem [resolvable:$true] %s182_s4 }
  0x20   : > { %s800_s5 = scalar_select %p82_p5, %s663_s14, %s84_s20  }
  0x21   : > { %s680_s0 = smov 2   ;;  %194 = sbr.rel (%p768_p12) target bundleno = 74 (0x4a), region = 32 }
  0x22   : > { %460 = dma.hbm_to_vmem [thread:$0]  (!%p781_p2), %s181_s30, 128, %s183_s4, %s170_s7, %s679_s8, %s679_s8, %s680_s0  }
  0x26   : > { %638 = dma.done.wait (%p741_p3), [#allocation5], 16  }
  0x27   : > { %640 = vsyncadd (%p741_p3), [#allocation5], 4294967280 }
  0x28   : > { %642 = dma.done.wait (%p741_p3), [#allocation7], 16  }
  0x29   : > { %644 = vsyncadd (%p741_p3), [#allocation7], 4294967280  ;;  %s815_s20 = sand.u32 1, %s659_s13  }
  0x2a   : > { %s417_s0 = sshll.u32 %s815_s20, 3  ;;  %s207_s29 = scalar_lea.sflag [#allocation3], %s815_s20 }
  0x2b   : > { %s210_s6 = scalar_lea.vmem [#allocation8], %s417_s0 }
  0x2c   : > { %646 = dma.done.wait (%p751_p7), %s207_s29, 128  }
  0x2d   : > { %648 = vsyncadd (%p751_p7), %s207_s29, 4294967168 }
  0x2e   : > { %216 = sfence }
  0x2f   : > { %s235_s10 = sld [smem:[#allocation6]]  ;;  %v239_v0 = vld [vmem:[%s210_s6] sm:$0x3]  ;;  %v421_v1 = vld [vmem:[%s210_s6 + $0x2] sm:$0x3]  ;;  %s418_s28 = sshll.u32 %s815_s20, 2 }
  0x30   : > { %s240_s11 = sld [smem:[#allocation2]]  ;;  %v424_v4 = vld [vmem:[%s210_s6 + $0x4] sm:$0x3]  ;;  %v427_v9 = vld [vmem:[%s210_s6 + $0x6] sm:$0x3]  ;;  %s437_s4 = sshll.u32 %s667_s15, 2 }
  0x31   : > { %s422_s18 = sld [smem:[#allocation2 + $0x1]]  ;;  %s294_s0 = scalar_lea.hbm %s868_s3, %s437_s4 }
  0x32   : > { %s425_s21 = sld [smem:[#allocation2 + $0x2]]  ;;  %s234_s29 = scalar_lea.vmem [#allocation9], %s418_s28 }
  0x33   : > { %s428_s19 = sld [smem:[#allocation2 + $0x3]]  ;;  %s295_s15 = sshll.u32 %s234_s29, 4  ;;  %s296_s15 = int_to_ptr.vmem [resolvable:$true] %s295_s15 }
  0x34   : > { %s823_s22 = sld [smem:[#allocation6 + $0x1]]  ;;  %s297_s6 = sshll.u32 %s294_s0, 4  ;;  %s298_s6 = int_to_ptr.hbm [resolvable:$true] %s297_s6 }
  0x35   : > { %s420_s26 = sld [smem:[#allocation2 + $0x4]]  ;;  %v236_v2 = vstv %s235_s10  ;;  %s282_s10 = scalar_lea.sflag [#allocation4], %s815_s20 }
  0x36   : > { %v241_v3 = vstv %s240_s11  ;;  %s423_s27 = sld [smem:[#allocation2 + $0x5]]  ;;  %s599_s11 = sshra.s32 %s298_s6, 4  ;;  %s600_s11 = int_to_ptr.hbm [resolvable:$true] %s599_s11 }
  0x37   : > { %v242_v5 = vmul.f32 %v241_v3, %v239_v0  ;;  %v251_v6 = vstv %s422_s18  ;;  %s426_s23 = sld [smem:[#allocation2 + $0x6]]  ;;  %s601_s18 = scalar_lea.hbm %s600_s11, 4 }
  0x38   : > { %v252_v7 = vmul.f32 %v421_v1, %v251_v6  ;;  %v261_v8 = vstv %s425_s21  ;;  %s429_s30 = sld [smem:[#allocation2 + $0x7]]  ;;  %p602_p3 = scmp.ne.s32.totalorder %s600_s11, %s601_s18 }
  0x39   : > { %v243_v10 = vadd.f32 %v242_v5, %v236_v2  ;;  %v262_v11 = vmul.f32 %v424_v4, %v261_v8  ;;  %v271_v12 = vstv %s428_s19  ;;  %p606_p11 = scmp.lt.s32.totalorder %s600_s11, %s868_s3 }
  0x3a   : > { %v272_v14 = vmul.f32 %v427_v9, %v271_v12  ;;  %v238_v15 = vstv %s823_s22  ;;  %p603_p7 = pnand %p602_p3, %p755_p8  ;;  %s605_s22 = scalar_lea.hbm %s868_s3, 8 }
  0x3b   : > { %v253_v13 = vadd.f32 %v252_v7, %v243_v10  ;;  %v245_v16 = vstv %s420_s26  ;;  %p607_p12 = scmp.lt.s32.totalorder %s605_s22, %s601_s18 }
  0x3c   : > { %v246_v17 = vmul.f32 %v245_v16, %v239_v0  ;;  %v255_v18 = vstv %s423_s27  ;;  %p604_p10 = pneg %p603_p7 }
  0x3d   : > { %v263_v19 = vadd.f32 %v262_v11, %v253_v13  ;;  %v256_v20 = vmul.f32 %v421_v1, %v255_v18  ;;  %v265_v21 = vstv %s426_s23  ;;  %p608_p0 = por %p607_p12, %p606_p11 }
  0x3e   : > { %v247_v22 = vadd.f32 %v246_v17, %v238_v15  ;;  %v266_v23 = vmul.f32 %v424_v4, %v265_v21  ;;  %v275_v24 = vstv %s429_s30 }
  0x3f   : > { %v273_v25 = vadd.f32 %v272_v14, %v263_v19  ;;  %v276_v27 = vmul.f32 %v427_v9, %v275_v24  ;;  %p609_p1 = pnand %p608_p0, %p604_p10 }
  0x40   : > { %v257_v26 = vadd.f32 %v256_v20, %v247_v22 }
  0x41   : > { %278 = vst [vmem:[%s234_s29] sm:$0x3] %v273_v25 }
  0x42   : > { %v267_v28 = vadd.f32 %v266_v23, %v257_v26 }
  0x44   : > { %v277_v29 = vadd.f32 %v276_v27, %v267_v28 }
  0x46   : > { %430 = vst [vmem:[%s234_s29 + $0x2] sm:$0x3] %v277_v29 }
  0x47   : > { %612 = shalt.err (!%p609_p1)
}
  0x48   : > { %s681_s20 = smov 32   ;;  %s682_s23 = smov 2  }
  0x49   : > { %448 = dma.vmem_to_hbm [thread:$0]  (%p755_p8), %s296_s15, 64, %s298_s6, %s282_s10, %s681_s20, %s681_s20, %s682_s23  }
  0x4a PF: > { %s312_s30 = sand.u32 1, %s655_s12   ;;  %p462_p2 = pnand %p410_p13, %p759_p9 }
  0x4b   : > { %s313_s28 = scalar_lea.sflag [#allocation4], %s312_s30 }
  0x4c   : > { %p463_p4 = pneg %p462_p2 }
  0x4e   : > { %650 = dma.done.wait (%p463_p4), %s313_s28, 64  }
  0x4f   : > { %652 = vsyncadd (%p463_p4), %s313_s28, 4294967232  ;;  %s21_s17 = sadd.s32 1, %s675_s17   ;;  %s878_s12 = smov %s659_s13 }
  0x50   : > { %p18_p6 = scmp.ge.s32.totalorder %s21_s17, 4   ;;  %s879_s13 = smov %s663_s14 }
  0x51   : > { %s880_s14 = smov %s800_s5  ;;  %s881_s15 = smov %s671_s16 }
  0x52   : > { %s882_s16 = smov %s884_s9  ;;  %20 = sbr.rel (!%p18_p6) target bundleno = 10 (0xa), region = 90 }
  0x57   :  { %319 = vsyncpa [#allocation3], 1 }
  0x58   :  { %321 = vsyncpa [#allocation3 + $0x1], 1 }
  0x59   :  { %322 = vsyncpa [#allocation4], 1 }
  0x5a   :  { %324 = vsyncpa [#allocation4 + $0x1], 1 }
  0x5b   :  { %325 = vsyncpa [#allocation5], 1 }
  0x5c   :  { %327 = vsyncpa [#allocation5 + $0x1], 1 }
  0x5d   :  { %328 = vsyncpa [#allocation7], 1 }

</bundles_post_ra>
